<compile_context>
chip_gen: v5e
topology: v5e:2x2
jax: 0.10.0
libtpu: 0.0.40
codegen_flags: <defaults>
</compile_context>

<pallas_src>
import jax
import jax.numpy as jnp
from jax.experimental import pallas as pl
from jax.experimental.pallas import tpu as pltpu


# ---------------------------------------------------------------------------
# Kernels
# ---------------------------------------------------------------------------
def _recon_kernel_single_k(w_ref, x_ref, o_ref):
    """Whole contraction in one step: no accumulator, no init/finalize."""
    o_ref[0] = jnp.dot(
        w_ref[...], x_ref[0], preferred_element_type=jnp.float32
    ).astype(o_ref.dtype)


def _recon_kernel_multi_k_f32(w_ref, x_ref, o_ref):
    """K-tiled path, f32 output: accumulate directly into the output block
    (its block index is invariant across the k axis, so it stays in VMEM)."""
    k = pl.program_id(3)
    part = jnp.dot(w_ref[...], x_ref[0], preferred_element_type=jnp.float32)

    @pl.when(k == 0)
    def _():
        o_ref[0] = part

    @pl.when(k > 0)
    def _():
        o_ref[0] += part


def _recon_kernel_multi_k_acc(w_ref, x_ref, o_ref, acc_ref):
    """K-tiled path, narrow output dtype: f32 scratch accumulator,
    initialized by assignment on k==0 (no zero + add), single writeback."""
    k = pl.program_id(3)
    part = jnp.dot(w_ref[...], x_ref[0], preferred_element_type=jnp.float32)

    @pl.when(k == 0)
    def _():
        acc_ref[...] = part

    @pl.when(k > 0)
    def _():
        acc_ref[...] += part

    @pl.when(k == pl.num_programs(3) - 1)
    def _():
        o_ref[0] = acc_ref[...].astype(o_ref.dtype)


# ---------------------------------------------------------------------------
# Wrapper
# ---------------------------------------------------------------------------
def _pick_tile(dim, cap, align):
    """Largest tile <= cap that divides dim and is `align`-aligned; else the
    full dim (a full-extent block is always a legal TPU block shape)."""
    if dim <= cap:
        return dim
    t = (cap // align) * align
    while t >= align:
        if dim % t == 0:
            return t
        t -= align
    return dim


def reconstruction_forward(inverse_transform, reconstruction):
    """out[b] = inverse_transform @ reconstruction[b] (torch.matmul semantics)."""
    squeeze_batch = False
    if reconstruction.ndim == 2:
        reconstruction = reconstruction[None]
        squeeze_batch = True

    M, K = inverse_transform.shape
    B, K2, N = reconstruction.shape
    assert K == K2, "contraction dims must match"

    out_dtype = jnp.result_type(inverse_transform.dtype, reconstruction.dtype)

    # Generation-safe tile caps: fit comfortably inside v7x's 64 MiB VMEM,
    # keep 128/256-wide MXUs fed, and keep the output store lane-dense.
    tm = _pick_tile(M, 256, 8)     # output sublane axis: mult. of 8 or full
    tn = _pick_tile(N, 512, 128)   # lane axis: mult. of 128 or full
    tk = _pick_tile(K, 512, 128)   # contraction: mult. of 128 or full

    # v7x has 2 TensorCores sharded over the "parallel" axes: make sure the
    # parallel grid has at least 2 iterations when the shapes allow it.
    if B * (M // tm) * (N // tn) < 2 and tn == N and N % 256 == 0:
        tn = N // 2

    n_k = K // tk
    grid_bmn = (B, M // tm, N // tn)

    # Advisory cost estimate for XLA's scheduler.
    flops = 2 * B * M * N * K
    bytes_accessed = (
        inverse_transform.size * inverse_transform.dtype.itemsize
        + reconstruction.size * reconstruction.dtype.itemsize
        + B * M * N * jnp.dtype(out_dtype).itemsize
    )
    cost = pl.CostEstimate(
        flops=flops, transcendentals=0, bytes_accessed=bytes_accessed
    )

    # VMEM budget: double-buffered input/output tiles (+ f32 accumulator).
    tile_bytes = 2 * (tm * tk + tk * tn + tm * tn) * 4 + tm * tn * 4
    vmem_limit = int(min(60 * 2**20, max(32 * 2**20, 2 * tile_bytes)))

    if n_k == 1:
        # Small-K fast path: no reduction axis, no accumulator; W's block
        # index is constant in (b, j), so the synthesis matrix stays
        # VMEM-resident across the whole batch / N sweep for each M tile.
        out = pl.pallas_call(
            _recon_kernel_single_k,
            out_shape=jax.ShapeDtypeStruct((B, M, N), out_dtype),
            grid_spec=pltpu.PrefetchScalarGridSpec(
                num_scalar_prefetch=0,
                grid=grid_bmn,
                in_specs=[
                    pl.BlockSpec((tm, K), lambda b, i, j: (i, 0)),
                    pl.BlockSpec((1, K, tn), lambda b, i, j: (b, 0, j)),
                ],
                out_specs=pl.BlockSpec((1, tm, tn), lambda b, i, j: (b, i, j)),
            ),
            compiler_params=pltpu.CompilerParams(
                dimension_semantics=("parallel", "parallel", "parallel"),
                vmem_limit_bytes=vmem_limit,
            ),
            cost_estimate=cost,
        )(inverse_transform, reconstruction)
    else:
        grid = grid_bmn + (n_k,)
        if out_dtype == jnp.float32:
            kernel = _recon_kernel_multi_k_f32
            scratch = []
        else:
            kernel = _recon_kernel_multi_k_acc
            scratch = [pltpu.VMEM((tm, tn), jnp.float32)]
        out = pl.pallas_call(
            kernel,
            out_shape=jax.ShapeDtypeStruct((B, M, N), out_dtype),
            grid_spec=pltpu.PrefetchScalarGridSpec(
                num_scalar_prefetch=0,
                grid=grid,
                in_specs=[
                    pl.BlockSpec((tm, tk), lambda b, i, j, k: (i, k)),
                    pl.BlockSpec((1, tk, tn), lambda b, i, j, k: (b, k, j)),
                ],
                out_specs=pl.BlockSpec(
                    (1, tm, tn), lambda b, i, j, k: (b, i, j)
                ),
                scratch_shapes=scratch,
            ),
            compiler_params=pltpu.CompilerParams(
                dimension_semantics=(
                    "parallel", "parallel", "parallel", "arbitrary"
                ),
                vmem_limit_bytes=vmem_limit,
            ),
            cost_estimate=cost,
        )(inverse_transform, reconstruction)

    return out[0] if squeeze_batch else out


if __name__ == "__main__":
    # Small, deterministic shapes: square wavelet synthesis matrix (M=K=32),
    # batch of 2 coefficient blocks with 128 columns each.
    B, M, K, N = 2, 32, 32, 128

    key = jax.random.PRNGKey(0)
    k_w, k_x = jax.random.split(key)
    inverse_transform = jax.random.normal(k_w, (M, K), dtype=jnp.float32)
    reconstruction = jax.random.normal(k_x, (B, K, N), dtype=jnp.float32)

    out = reconstruction_forward(inverse_transform, reconstruction)
    out = jax.block_until_ready(out)

    ref = jnp.einsum("mk,bkn->bmn", inverse_transform, reconstruction)
    assert out.shape == (B, M, N)
    assert jnp.allclose(out, ref, atol=1e-4, rtol=1e-4)

    print("KERNEL_OK")
</pallas_src>

<mosaic_0001>
module attributes {stable_mosaic.version = 11 : i64} {
  func.func @_recon_kernel_single_k(%arg0: i32, %arg1: i32, %arg2: i32, %arg3: memref<32x32xf32, #tpu.memory_space<vmem>>, %arg4: memref<1x32x128xf32, #tpu.memory_space<vmem>>, %arg5: memref<1x32x128xf32, #tpu.memory_space<vmem>>) attributes {dimension_semantics = [#tpu.dimension_semantics<parallel>, #tpu.dimension_semantics<parallel>, #tpu.dimension_semantics<parallel>], iteration_bounds = array<i64: 2, 1, 1>, scalar_prefetch = 0 : i64, scratch_operands = 0 : i64, tpu.core_type = #tpu.core_type<tc>, window_params = [{transform_indices = @transform_0, window_bounds = array<i64: 32, 32>}, {transform_indices = @transform_1, window_bounds = array<i64: 1, 32, 128>}, {transform_indices = @transform_2, window_bounds = array<i64: 1, 32, 128>}]} {
    %c0 = arith.constant 0 : index
    %c0_0 = arith.constant 0 : index
    %0 = vector.load %arg3[%c0, %c0_0] : memref<32x32xf32, #tpu.memory_space<vmem>>, vector<32x32xf32>
    %c0_1 = arith.constant 0 : index
    %c0_2 = arith.constant 0 : index
    %c0_3 = arith.constant 0 : index
    %1 = vector.load %arg4[%c0_1, %c0_2, %c0_3] : memref<1x32x128xf32, #tpu.memory_space<vmem>>, vector<1x32x128xf32>
    %2 = vector.shape_cast %1 : vector<1x32x128xf32> to vector<32x128xf32>
    %cst = arith.constant dense<0.000000e+00> : vector<32x128xf32>
    %3 = tpu.matmul %0, %2, %cst {dimension_numbers = #tpu.dot_dimension_numbers<[1], [0], [0], [1], [0, 0, 1, 1], [], []>} : vector<32x32xf32>, vector<32x128xf32>, vector<32x128xf32> -> vector<32x128xf32>
    %c0_4 = arith.constant 0 : index
    %c0_5 = arith.constant 0 : index
    %c0_6 = arith.constant 0 : index
    %4 = vector.load %arg5[%c0_4, %c0_5, %c0_6] : memref<1x32x128xf32, #tpu.memory_space<vmem>>, vector<1x32x128xf32>
    %5 = vector.shape_cast %4 : vector<1x32x128xf32> to vector<32x128xf32>
    %6 = vector.shape_cast %3 : vector<32x128xf32> to vector<1x32x128xf32>
    tpu.vector_store %arg5[%c0_4, %c0_5, %c0_6], %6 {strides = array<i32>} : memref<1x32x128xf32, #tpu.memory_space<vmem>>, vector<1x32x128xf32>,
    return
  }
  func.func @transform_0(%arg0: i32, %arg1: i32, %arg2: i32) -> (i32, i32) {
    %c0_i32 = arith.constant 0 : i32
    %c0_i32_0 = arith.constant 0 : i32
    return %arg1, %c0_i32 : i32, i32
  }
  func.func @transform_1(%arg0: i32, %arg1: i32, %arg2: i32) -> (i32, i32, i32) {
    %c0_i32 = arith.constant 0 : i32
    %c0_i32_0 = arith.constant 0 : i32
    return %arg0, %c0_i32, %arg2 : i32, i32, i32
  }
  func.func @transform_2(%arg0: i32, %arg1: i32, %arg2: i32) -> (i32, i32, i32) {
    %c0_i32 = arith.constant 0 : i32
    return %arg0, %arg1, %arg2 : i32, i32, i32
  }
}

</mosaic_0001>

<bundles_post_ra>
// kernel: tpu_custom_call.1
= control target key start
LH: loop header
LB: loop body
LE: loop exit
PB: predicated region body
PF: predicated region fallthrough
CT: control target
= control target key end

     0   :  { %7 = vsyncpa [#allocation3], 0  ;;  %s833_s0 = inlined_call_operand.hbm [shape: f32[32,32], index: 0, kind: input, shape index: {}]   ;;  %s834_s1 = inlined_call_operand.hbm [shape: f32[2,32,128], index: 1, kind: input, shape index: {}]   ;;  %s835_s2 = inlined_call_operand.hbm [shape: f32[2,32,128], index: 2, kind: output, shape index: {}]  }
   0x1   :  { %8 = vsyncpa [#allocation6], 0 }
   0x2   :  { %10 = vsyncpa [#allocation6 + $0x1], 0 }
   0x3   :  { %11 = vsyncpa [#allocation4], 0 }
   0x4   :  { %13 = vsyncpa [#allocation4 + $0x1], 0  ;;  %s674_s9 = smov 0   ;;  %s676_s10 = smov 0  }
   0x5   :  { %s678_s11 = smov 0   ;;  %s680_s12 = smov 0  }
   0x6   :  { %s682_s13 = smov 0   ;;  %s684_s14 = smov 0  }
   0x7 LB: > { %s394_s15 = sadd.s32 4294967295, %s652_s14   ;;  %s395_s16 = sadd.s32 4294967294, %s652_s14   ;;  %s652_s14 = sphi %s684_s14, %s19_s14   ;;  %s648_s13 = sphi %s682_s13, %s847_s13   ;;  %s644_s12 = sphi %s680_s12, %s846_s12   ;;  %s640_s11 = sphi %s678_s11, %s845_s11   ;;  %s636_s10 = sphi %s676_s10, %s844_s10   ;;  %s632_s9 = sphi %s674_s9, %s843_s9  }
   0x8   : > { %p86_p0 = scmp.ne.s32.totalorder %s636_s10, %s632_s9  ;;  %p708_p1 = scmp.eq.s32.totalorder %s394_s15, 0 }
   0x9   : > { %p712_p2 = scmp.eq.s32.totalorder %s394_s15, 1  ;;  %p120_p3 = scmp.eq.s32.totalorder %s395_s16, 1 }
   0xa   : > { %p718_p4 = por %p708_p1, %p86_p0  ;;  %p396_p5 = scmp.ge.s32.totalorder %s652_s14, 1 }
   0xb   : > { %p723_p6 = por %p120_p3, %p86_p0  ;;  %p127_p7 = scmp.lt.s32.totalorder %s652_s14, 3 }
   0xc   : > { %s141_s23 = sshll.u32 %s833_s0, 4  ;;  %s654_s25 = smov [#allocation2]   ;;  %s142_s23 = int_to_ptr.hbm [resolvable:$true] %s141_s23 }
   0xd   : > { %p731_p8 = pnand %p396_p5, %p127_p7  ;;  %s143_s26 = sshll.u32 %s654_s25, 4  ;;  %s144_s26 = int_to_ptr.vmem [resolvable:$true] %s143_s26 }
   0xe   : > { %p398_p11 = scmp.ge.s32.totalorder %s652_s14, 2  ;;  %s655_s27 = smov 128  }
   0xf   : > { %p437_p9 = pneg %p731_p8  ;;  %s656_s28 = smov 8  }
  0x10   : > { %s38_s29 = sadd.s32 1, %s648_s13  ;;  %s73_s30 = sadd.s32 1, %s640_s11 }
  0x11   : > { %p438_p10 = pnand %p437_p9, %p708_p1  ;;  %p40_p12 = scmp.ge.s32.totalorder %s38_s29, 2 }
  0x12   : > { %p80_p13 = scmp.ne.s32.totalorder %s640_s11, %s636_s10  ;;  %p81_p0 = scmp.eq.s32.totalorder %s652_s14, 0 }
  0x13   : > { %440 = dma.hbm_to_vmem [thread:$0]  (!%p438_p10), %s142_s23, 512, %s144_s26, [#allocation3], %s655_s27, %s655_s27, %s656_s28  }
  0x14   : > { %s849_s29 = smov (%p40_p12, %s38_s29), 0  ;;  %p750_p3 = por %p81_p0, %p80_p13 }
  0x15   : > { %p756_p5 = por %p712_p2, %p80_p13  ;;  %s68_s5 = ssub.s32 %s648_s13, %s849_s29 }
  0x16   : > { %p450_p7 = scmp.lt.s32.totalorder %s652_s14, 2  ;;  %p71_p9 = scmp.eq.s32.totalorder %s68_s5, 0 }
  0x17   : > { %s157_s6 = sand.u32 1, %s640_s11   ;;  %s415_s15 = sshll.u32 %s648_s13, 5 }
  0x18   : > { %s399_s7 = sshll.u32 %s157_s6, 5  ;;  %s167_s22 = scalar_lea.hbm %s834_s1, %s415_s15 }
  0x19   : > { %s765_s8 = scalar_select %p71_p9, %s640_s11, %s73_s30  }
  0x1a   : > { %s161_s23 = scalar_lea.vmem [#allocation5], %s399_s7  ;;  %s168_s18 = sshll.u32 %s167_s22, 4  ;;  %s169_s18 = int_to_ptr.hbm [resolvable:$true] %s168_s18 }
  0x1b   : > { %s170_s25 = sshll.u32 %s161_s23, 4  ;;  %p442_p2 = pnand %p450_p7, %p750_p3  ;;  %s171_s25 = int_to_ptr.vmem [resolvable:$true] %s170_s25 }
  0x1c   : > { %s158_s26 = scalar_lea.sflag [#allocation6], %s157_s6  ;;  %182 = sbr.rel (%p731_p8) target bundleno = 183 (0xb7), region = 28 }
  0x1d   : > { %444 = dma.hbm_to_vmem [thread:$0]  (!%p442_p2), %s169_s18, 512, %s171_s25, %s158_s26, %s655_s27, %s655_s27, %s656_s28  }
  0x21   : > { %619 = dma.done.wait (%p708_p1), [#allocation3], 512  }
  0x22   : > { %621 = vsyncadd (%p708_p1), [#allocation3], 4294966784  ;;  %s783_s30 = sand.u32 1, %s636_s10  }
  0x23   : > { %s404_s3 = sshll.u32 %s783_s30, 5  ;;  %s190_s5 = scalar_lea.sflag [#allocation6], %s783_s30 }
  0x24   : > { %s193_s27 = scalar_lea.vmem [#allocation5], %s404_s3 }
  0x25   : > { %623 = dma.done.wait (%p718_p4), %s190_s5, 512  }
  0x26   : > { %625 = vsyncadd (%p718_p4), %s190_s5, 4294966784  ;;  %v224_v0 = vld [vmem:[%s193_s27 + $0x18] sm:$0xff]  ;;  %v223_v1 = vld [vmem:[%s193_s27 + $0x10] sm:$0xff]  ;;  %vm225_vm0 = vcmask 261120   ;;  %s416_s17 = sshll.u32 %s644_s12, 5  ;;  %s214_s6 = scalar_lea.vmem [#allocation7], %s404_s3 }
  0x27   : > { %418 = vmatpush.msra.mxu2 %v224_v0  ;;  %419 = vmatpush.msra.mxu3 %v224_v0  ;;  %v222_v2 = vld [vmem:[%s193_s27 + $0x8] sm:$0xff]  ;;  %v221_v3 = vld [vmem:[%s193_s27] sm:$0xff]  ;;  %v219_v4 = vld [vmem:[#allocation2 + $0x10] sm:$0xff]  ;;  %s286_s28 = scalar_lea.hbm %s835_s2, %s416_s17  ;;  %s287_s7 = sshll.u32 %s214_s6, 4  ;;  %s288_s7 = int_to_ptr.vmem [resolvable:$true] %s287_s7 }
  0x28   : > { %250 = vmatpush.msra.mxu0 %v224_v0  ;;  %417 = vmatpush.msra.mxu1 %v224_v0  ;;  %v220_v5 = vld [vmem:[#allocation2 + $0x18] sm:$0xff]  ;;  %v217_v6 = vld [vmem:[#allocation2] sm:$0xff]  ;;  %v218_v7 = vld [vmem:[#allocation2 + $0x8] sm:$0xff]  ;;  %s289_s15 = sshll.u32 %s286_s28, 4  ;;  %s272_s12 = scalar_lea.sflag [#allocation4], %s783_s30  ;;  %s290_s15 = int_to_ptr.hbm [resolvable:$true] %s289_s15 }
  0x29   : > { %421 = vmatpush.msra.mxu2 %v223_v1  ;;  %422 = vmatpush.msra.mxu3 %v223_v1  ;;  %s580_s16 = sshra.s32 %s290_s15, 4  ;;  %s586_s25 = scalar_lea.hbm %s835_s2, 64  ;;  %s581_s16 = int_to_ptr.hbm [resolvable:$true] %s580_s16 }
  0x2a   : > { %251 = vmatpush.msra.mxu0 %v223_v1  ;;  %420 = vmatpush.msra.mxu1 %v223_v1  ;;  %s582_s21 = scalar_lea.hbm %s581_s16, 32  ;;  %p587_p10 = scmp.lt.s32.totalorder %s581_s16, %s835_s2 }
  0x2b   : > { %424 = vmatpush.msra.mxu2 %v222_v2  ;;  %425 = vmatpush.msra.mxu3 %v222_v2  ;;  %p583_p1 = scmp.ne.s32.totalorder %s581_s16, %s582_s21  ;;  %p588_p12 = scmp.lt.s32.totalorder %s586_s25, %s582_s21 }
  0x2c   : > { %252 = vmatpush.msra.mxu0 %v222_v2  ;;  %423 = vmatpush.msra.mxu1 %v222_v2 }
  0x2d   : > { %427 = vmatpush.msra.mxu2 %v221_v3  ;;  %428 = vmatpush.msra.mxu3 %v221_v3  ;;  %p584_p4 = pnand %p583_p1, %p756_p5  ;;  %p589_p13 = por %p588_p12, %p587_p10 }
  0x2e   : > { %408 = vmatmul.msk.f32.vlgmr.msra.gmra.mxu2 %vm225_vm0, %v219_v4  ;;  %409 = vmatmul.msk.f32.vlgmr.msra.gmra.mxu3 %vm225_vm0, %v220_v5 }
  0x2f   : > { %253 = vmatpush.msra.mxu0 %v221_v3  ;;  %426 = vmatpush.msra.mxu1 %v221_v3  ;;  %p585_p8 = pneg %p584_p4 }
  0x30   : > { %406 = vmatmul.msk.f32.vlgmr.msra.gmra.mxu0 %vm225_vm0, %v217_v6  ;;  %407 = vmatmul.msk.f32.vlgmr.msra.gmra.mxu1 %vm225_vm0, %v218_v7 }
  0x31   : > { %p590_p0 = pnand %p589_p13, %p585_p8 }
  0xad   : > { %v255_v8 = vpop.f32.mrf.mxu0  ;;  %v258_v9 = vpop.f32.mrf.mxu1 }
  0xae   : > { %267 = vst [vmem:[%s214_s6] sm:$0xff] %v255_v8 }
  0xaf   : > { %268 = vst [vmem:[%s214_s6 + $0x8] sm:$0xff] %v258_v9 }
  0xb1   : > { %v261_v10 = vpop.f32.mrf.mxu2  ;;  %v264_v11 = vpop.f32.mrf.mxu3 }
  0xb2   : > { %269 = vst [vmem:[%s214_s6 + $0x10] sm:$0xff] %v261_v10 }
  0xb3   : > { %270 = vst [vmem:[%s214_s6 + $0x18] sm:$0xff] %v264_v11 }
  0xb4   : > { %593 = shalt.err (!%p590_p0)
}
  0xb5   : > { %s657_s30 = smov 128   ;;  %s658_s3 = smov 8  }
  0xb6   : > { %435 = dma.vmem_to_hbm [thread:$0]  (%p756_p5), %s288_s7, 512, %s290_s15, %s272_s12, %s657_s30, %s657_s30, %s658_s3  }
  0xb7 PF: > { %s304_s5 = sand.u32 1, %s632_s9   ;;  %p446_p3 = pnand %p398_p11, %p723_p6 }
  0xb8   : > { %s305_s27 = scalar_lea.sflag [#allocation4], %s304_s5 }
  0xb9   : > { %p447_p7 = pneg %p446_p3 }
  0xbb   : > { %627 = dma.done.wait (%p447_p7), %s305_s27, 512  }
  0xbc   : > { %629 = vsyncadd (%p447_p7), %s305_s27, 4294966784  ;;  %s19_s14 = sadd.s32 1, %s652_s14   ;;  %s843_s9 = smov %s636_s10 }
  0xbd   : > { %p16_p9 = scmp.ge.s32.totalorder %s19_s14, 4   ;;  %s844_s10 = smov %s640_s11 }
  0xbe   : > { %s845_s11 = smov %s765_s8  ;;  %s846_s12 = smov %s648_s13 }
  0xbf   : > { %s847_s13 = smov %s849_s29  ;;  %18 = sbr.rel (!%p16_p9) target bundleno = 7 (0x7), region = 79 }
  0xc4   :  { %311 = vsyncpa [#allocation3], 1 }
  0xc5   :  { %313 = vsyncpa [#allocation3 + $0x1], 1 }
  0xc6   :  { %314 = vsyncpa [#allocation6], 1 }
  0xc7   :  { %316 = vsyncpa [#allocation6 + $0x1], 1 }
  0xc8   :  { %317 = vsyncpa [#allocation4], 1 }
  0xc9   :  { %319 = vsyncpa [#allocation4 + $0x1], 1 }

</bundles_post_ra>
